<compile_context>
chip_gen: v5e
topology: v5e:2x2
jax: 0.10.0
libtpu: 0.0.40
codegen_flags: <defaults>
</compile_context>

<pallas_src>
import numpy as np
import jax
import jax.numpy as jnp
from jax.experimental import pallas as pl
from jax.experimental.pallas import tpu as pltpu

# ---------------- configuration (mirrors dataset / args in Network.__init__) --------
EMBEDDING_DIM     = 8
NUM_DENSE         = 3
NUM_SPARSE        = 5
DENSE_FIELD_DIMS  = [1] * NUM_DENSE
SPARSE_FIELD_DIMS = [7, 5, 6, 4, 9]
FIELD_DIMS        = DENSE_FIELD_DIMS + SPARSE_FIELD_DIMS
BLOCK_IN_DIM      = 16
BLOCK_OUT_DIM     = BLOCK_IN_DIM                 # Network sets block_out_dim = block_in_dim
WEIGHTS_REG       = 1e-4
RAW_DENSE_DIM     = EMBEDDING_DIM * NUM_DENSE
RAW_SPARSE_DIM    = EMBEDDING_DIM * NUM_SPARSE
NUM_EMB_ROWS      = int(sum(FIELD_DIMS))

# fixed architecture (the `arch` argument of FixedNetwork)
#   node 0 = dense embedding node (type 1), node 1 = sparse embedding node (type 2)
BLOCK_INPUTS = [(0, 1), (0, 2)]                  # two MLP blocks, each with 2 inputs
CONCAT_IDX   = [2, 3]                            # concat both block outputs
NODE2TYPE    = [1, 2] + [3] * len(BLOCK_INPUTS)
TYPE2DIM     = {1: RAW_DENSE_DIM, 2: RAW_SPARSE_DIM, 3: BLOCK_OUT_DIM}

# sparse offsets, computed exactly as in the PyTorch Network.__init__
_cumsum        = np.cumsum(FIELD_DIMS)
SPARSE_OFFSETS = np.array((0, *_cumsum[NUM_DENSE:-1]), dtype=np.int32)

# ---- packed bf16 weight array row layout (segments 16-row aligned for the bf16
#      (16,128) sublane tiling so the static slices stay cheap) ----------------------
R_M     = 0                        # (3, 32)   fused dense matrices, block0 | block1
R_T     = 16                       # (34, 16)  fused sparse table (block 0, slot 1)
R_WM0   = 64                       # (16, 16)  block 0 mid Linear
R_W1B1  = 80                       # (16, 16)  block 1 projection of node 2 (= y0)
R_WM1   = 96                       # (16, 16)  block 1 mid Linear
WB_ROWS = 112
WB_COLS = 2 * BLOCK_IN_DIM         # 32

# ---- packed f32 bias / classifier array rows ----------------------------------------
F_BIAS_H0, F_BM0, F_BIAS_H1, F_BM1, F_CW0, F_CW1, F_CB = range(7)
WF_ROWS = 8
WF_COLS = BLOCK_IN_DIM             # 16


# ------------------------------- fused Pallas kernel --------------------------------
def fused_forward_kernel(dense_ref, sidx_ref, wb_ref, wf_ref, out_ref):
    """Whole FixedNetwork forward for one batch tile.

    5 MXU matmuls total per grid step (bf16 operands, f32 accumulation):
      (tb,3)@(3,32) dense projection for both blocks, (tb,34)@(34,16) multi-hot
      sparse projection, and three (tb,16)@(16,16) block matmuls.  The N=1
      classifier runs on the VPU/XLU instead of the MXU.
    """
    tb = dense_ref.shape[0]

    dense = dense_ref[...]                                      # (tb, 3)  f32
    sidx  = sidx_ref[...]                                       # (tb, 5)  i32 (offsets pre-added)

    # --- node 0 (dense) projection for BOTH blocks: one (tb,3)@(3,32) matmul -------
    m = wb_ref[R_M:R_M + NUM_DENSE, :]                          # (3, 32) bf16
    d_proj = jnp.dot(dense.astype(jnp.bfloat16), m,
                     preferred_element_type=jnp.float32)        # (tb, 32) f32
    d0 = d_proj[:, :BLOCK_IN_DIM]
    d1 = d_proj[:, BLOCK_IN_DIM:]

    # --- node 1 (sparse): single multi-hot matmul against the fused table T --------
    lanes = jax.lax.broadcasted_iota(jnp.int32, (tb, NUM_EMB_ROWS), 1)
    mh = lanes == sidx[:, 0:1]
    for f in range(1, NUM_SPARSE):                              # field row-ranges are disjoint
        mh = mh | (lanes == sidx[:, f:f + 1])
    multihot = jnp.where(mh, 1.0, 0.0).astype(jnp.bfloat16)     # exact in bf16
    t_tab = wb_ref[R_T:R_T + NUM_EMB_ROWS, :BLOCK_IN_DIM]       # (34, 16) bf16
    s_proj = jnp.dot(multihot, t_tab,
                     preferred_element_type=jnp.float32)        # (tb, 16) f32

    # --- block 0: inputs (node 0, node 1) -------------------------------------------
    h0 = d0 + s_proj + wf_ref[F_BIAS_H0:F_BIAS_H0 + 1, :]
    y0 = jnp.dot(h0.astype(jnp.bfloat16),
                 wb_ref[R_WM0:R_WM0 + BLOCK_IN_DIM, :BLOCK_IN_DIM],
                 preferred_element_type=jnp.float32) + wf_ref[F_BM0:F_BM0 + 1, :]
    y0 = jnp.maximum(y0, 0.0)                                   # node 2

    # --- block 1: inputs (node 0, node 2 == y0) --------------------------------------
    h1 = (d1
          + jnp.dot(y0.astype(jnp.bfloat16),
                    wb_ref[R_W1B1:R_W1B1 + BLOCK_IN_DIM, :BLOCK_IN_DIM],
                    preferred_element_type=jnp.float32)
          + wf_ref[F_BIAS_H1:F_BIAS_H1 + 1, :])
    y1 = jnp.dot(h1.astype(jnp.bfloat16),
                 wb_ref[R_WM1:R_WM1 + BLOCK_IN_DIM, :BLOCK_IN_DIM],
                 preferred_element_type=jnp.float32) + wf_ref[F_BM1:F_BM1 + 1, :]
    y1 = jnp.maximum(y1, 0.0)                                   # node 3

    # --- classifier (N=1): VPU multiply + cross-lane reduce, no MXU ------------------
    logits = (wf_ref[F_CB:F_CB + 1, 0:1]
              + jnp.sum(y0 * wf_ref[F_CW0:F_CW0 + 1, :], axis=-1, keepdims=True)
              + jnp.sum(y1 * wf_ref[F_CW1:F_CW1 + 1, :], axis=-1, keepdims=True))
    out_ref[...] = logits


# ------------------------------- wrapper --------------------------------------------
def _choose_tile(batch):
    """Pad batch to a multiple of 8, cap TB at 512, and (when possible) give the
    'parallel' batch grid >= 2 steps so both v7x TensorCores get work."""
    bp = -(-batch // 8) * 8
    tb = min(512, bp)
    if bp > 8 and bp // tb < 2:
        half = -(-bp // 2)
        tb = -(-half // 8) * 8
    bp = -(-bp // tb) * tb
    return bp, tb


def _pack_weights(params):
    """Fold the embedding table into per-block fused projection tables and pack all
    weights into two small, tile-aligned VMEM-resident arrays."""
    emb = params["embedding"]                                   # (34, 8) f32
    blk0, blk1 = params["blocks"]

    def fuse_dense(w):                                          # w: (24, 16)
        w3 = w.reshape(NUM_DENSE, EMBEDDING_DIM, BLOCK_IN_DIM)
        return jnp.einsum("fe,fen->fn", emb[:NUM_DENSE], w3)    # (3, 16)

    m_pack = jnp.concatenate([fuse_dense(blk0["w0"]), fuse_dense(blk1["w0"])],
                             axis=1)                            # (3, 32)

    # fused sparse table: T[r] = emb[r] @ w1_blk0[8*field(r) : 8*field(r)+8]
    field_of_row = np.zeros(NUM_EMB_ROWS, dtype=np.int32)
    for f in range(NUM_SPARSE):
        start = int(SPARSE_OFFSETS[f])
        field_of_row[start:start + SPARSE_FIELD_DIMS[f]] = f
    w1_3 = blk0["w1"].reshape(NUM_SPARSE, EMBEDDING_DIM, BLOCK_IN_DIM)
    t_tab = jnp.einsum("re,ren->rn", emb, w1_3[field_of_row])   # (34, 16)

    wb = jnp.zeros((WB_ROWS, WB_COLS), jnp.float32)
    wb = wb.at[R_M:R_M + NUM_DENSE, :].set(m_pack)
    wb = wb.at[R_T:R_T + NUM_EMB_ROWS, :BLOCK_IN_DIM].set(t_tab)
    wb = wb.at[R_WM0:R_WM0 + BLOCK_IN_DIM, :BLOCK_IN_DIM].set(blk0["wm"])
    wb = wb.at[R_W1B1:R_W1B1 + BLOCK_IN_DIM, :BLOCK_IN_DIM].set(blk1["w1"])
    wb = wb.at[R_WM1:R_WM1 + BLOCK_IN_DIM, :BLOCK_IN_DIM].set(blk1["wm"])
    wb = wb.astype(jnp.bfloat16)                                # MXU RHS in bf16

    wf = jnp.zeros((WF_ROWS, WF_COLS), jnp.float32)             # VPU math stays f32
    wf = wf.at[F_BIAS_H0, :].set((blk0["b0"] + blk0["b1"])[0])
    wf = wf.at[F_BM0, :].set(blk0["bm"][0])
    wf = wf.at[F_BIAS_H1, :].set((blk1["b0"] + blk1["b1"])[0])
    wf = wf.at[F_BM1, :].set(blk1["bm"][0])
    wf = wf.at[F_CW0, :].set(params["cls_w"][:BLOCK_OUT_DIM, 0])
    wf = wf.at[F_CW1, :].set(params["cls_w"][BLOCK_OUT_DIM:, 0])
    wf = wf.at[F_CB, 0].set(params["cls_b"][0, 0])
    return wb, wf


def forward(params, raw_dense, raw_sparse):
    batch = raw_dense.shape[0]
    bp, tb = _choose_tile(batch)

    # offset shift is a trivial fused XLA add; the gather is fused into the kernel
    sparse_idx = (raw_sparse + jnp.asarray(SPARSE_OFFSETS)[None, :]).astype(jnp.int32)
    dense = raw_dense.astype(jnp.float32)
    if bp != batch:
        pad = bp - batch
        dense = jnp.pad(dense, ((0, pad), (0, 0)))
        sparse_idx = jnp.pad(sparse_idx, ((0, pad), (0, 0)))

    wb, wf = _pack_weights(params)

    flops_row = (2 * NUM_DENSE * 2 * BLOCK_IN_DIM            # fused dense projection
                 + 2 * NUM_EMB_ROWS * BLOCK_IN_DIM            # multi-hot sparse projection
                 + 3 * 2 * BLOCK_IN_DIM * BLOCK_OUT_DIM       # block matmuls
                 + 2 * len(CONCAT_IDX) * BLOCK_OUT_DIM)       # classifier (VPU)
    cost = pl.CostEstimate(
        flops=bp * flops_row, transcendentals=0,
        bytes_accessed=4 * bp * (NUM_DENSE + NUM_SPARSE + 1) + wb.size * 2 + wf.size * 4)

    logits = pl.pallas_call(
        fused_forward_kernel,
        out_shape=jax.ShapeDtypeStruct((bp, 1), jnp.float32),
        grid=(bp // tb,),
        in_specs=[
            pl.BlockSpec((tb, NUM_DENSE), lambda i: (i, 0)),
            pl.BlockSpec((tb, NUM_SPARSE), lambda i: (i, 0)),
            pl.BlockSpec((WB_ROWS, WB_COLS), lambda i: (0, 0)),   # VMEM-resident weights
            pl.BlockSpec((WF_ROWS, WF_COLS), lambda i: (0, 0)),
        ],
        out_specs=pl.BlockSpec((tb, 1), lambda i: (i, 0)),
        compiler_params=pltpu.CompilerParams(
            dimension_semantics=("parallel",),        # shard batch grid across TCs (v7x)
            vmem_limit_bytes=32 * 1024 * 1024,        # safe on v7x's 64 MiB physical VMEM
        ),
        cost_estimate=cost,
    )(dense, sparse_idx, wb, wf)

    logits = logits[:batch]

    # regs = weights_reg * sum_p ||p||_F over all trainable parameters (params-only,
    # computed once in plain jnp so XLA fuses it - no extra kernel launches).
    norms = jnp.float32(0.0)
    for p in jax.tree_util.tree_leaves(params):
        norms = norms + jnp.sqrt(jnp.sum(jnp.square(p)))
    regs = jnp.float32(WEIGHTS_REG) * norms
    return logits, regs


# ------------------------------- parameters ---------------------------------------
def init_params(key):
    keys = iter(jax.random.split(key, 64))
    params = {}
    # embedding table: xavier_uniform_ like the PyTorch module
    bound = float(np.sqrt(6.0 / (NUM_EMB_ROWS + EMBEDDING_DIM)))
    params["embedding"] = jax.random.uniform(
        next(keys), (NUM_EMB_ROWS, EMBEDDING_DIM),
        minval=-bound, maxval=bound, dtype=jnp.float32)

    blocks = []
    for inputs_idx in BLOCK_INPUTS:
        blk = {}
        for slot, node_idx in enumerate(inputs_idx):
            in_dim = TYPE2DIM[NODE2TYPE[node_idx]]
            b = float(1.0 / np.sqrt(in_dim))
            blk[f"w{slot}"] = jax.random.uniform(next(keys), (in_dim, BLOCK_IN_DIM),
                                                 minval=-b, maxval=b, dtype=jnp.float32)
            blk[f"b{slot}"] = jax.random.uniform(next(keys), (1, BLOCK_IN_DIM),
                                                 minval=-b, maxval=b, dtype=jnp.float32)
        b = float(1.0 / np.sqrt(BLOCK_IN_DIM))
        blk["wm"] = jax.random.uniform(next(keys), (BLOCK_IN_DIM, BLOCK_OUT_DIM),
                                       minval=-b, maxval=b, dtype=jnp.float32)
        blk["bm"] = jax.random.uniform(next(keys), (1, BLOCK_OUT_DIM),
                                       minval=-b, maxval=b, dtype=jnp.float32)
        blocks.append(blk)
    params["blocks"] = blocks

    cls_in = len(CONCAT_IDX) * BLOCK_OUT_DIM
    b = float(1.0 / np.sqrt(cls_in))
    params["cls_w"] = jax.random.uniform(next(keys), (cls_in, 1),
                                         minval=-b, maxval=b, dtype=jnp.float32)
    params["cls_b"] = jax.random.uniform(next(keys), (1, 1),
                                         minval=-b, maxval=b, dtype=jnp.float32)
    return params


# ------------------------------- main ----------------------------------------------
if __name__ == "__main__":
    key = jax.random.PRNGKey(0)
    k_dense, k_sparse, k_params = jax.random.split(key, 3)

    B = 8
    raw_dense = jax.random.uniform(k_dense, (B, NUM_DENSE), dtype=jnp.float32)
    sparse_cols = []
    for f, fd in enumerate(SPARSE_FIELD_DIMS):
        kf = jax.random.fold_in(k_sparse, f)
        sparse_cols.append(jax.random.randint(kf, (B, 1), 0, fd, dtype=jnp.int32))
    raw_sparse = jnp.concatenate(sparse_cols, axis=1)

    params = init_params(k_params)

    logits, regs = jax.jit(forward)(params, raw_dense, raw_sparse)
    jax.block_until_ready((logits, regs))
    assert logits.shape == (B, 1)
    assert regs.shape == ()
    print("KERNEL_OK")
</pallas_src>

<mosaic_0001>
module attributes {stable_mosaic.version = 11 : i64} {
  func.func @fused_forward_kernel(%arg0: i32, %arg1: memref<8x3xf32, #tpu.memory_space<vmem>>, %arg2: memref<8x5xi32, #tpu.memory_space<vmem>>, %arg3: memref<112x32xbf16, #tpu.memory_space<vmem>>, %arg4: memref<8x16xf32, #tpu.memory_space<vmem>>, %arg5: memref<8x1xf32, #tpu.memory_space<vmem>>) attributes {dimension_semantics = [#tpu.dimension_semantics<parallel>], iteration_bounds = array<i64: 1>, scalar_prefetch = 0 : i64, scratch_operands = 0 : i64, tpu.core_type = #tpu.core_type<tc>, window_params = [{transform_indices = @transform_0, window_bounds = array<i64: 8, 3>}, {transform_indices = @transform_1, window_bounds = array<i64: 8, 5>}, {pipeline_mode = #tpu.pipeline_mode<synchronous>, transform_indices = @transform_2, window_bounds = array<i64: 112, 32>}, {pipeline_mode = #tpu.pipeline_mode<synchronous>, transform_indices = @transform_3, window_bounds = array<i64: 8, 16>}, {transform_indices = @transform_4, window_bounds = array<i64: 8, 1>}]} {
    %c0 = arith.constant 0 : index
    %c0_0 = arith.constant 0 : index
    %0 = vector.load %arg1[%c0, %c0_0] : memref<8x3xf32, #tpu.memory_space<vmem>>, vector<8x3xf32>
    %c0_1 = arith.constant 0 : index
    %c0_2 = arith.constant 0 : index
    %1 = vector.load %arg2[%c0_1, %c0_2] : memref<8x5xi32, #tpu.memory_space<vmem>>, vector<8x5xi32>
    %c0_3 = arith.constant 0 : index
    %c0_4 = arith.constant 0 : index
    %2 = vector.load %arg3[%c0_3, %c0_4] : memref<112x32xbf16, #tpu.memory_space<vmem>>, vector<3x32xbf16>
    %3 = arith.truncf %0 : vector<8x3xf32> to vector<8x3xbf16>
    %cst = arith.constant dense<0.000000e+00> : vector<8x32xf32>
    %4 = tpu.matmul %3, %2, %cst {dimension_numbers = #tpu.dot_dimension_numbers<[1], [0], [0], [1], [0, 0, 1, 1], [], []>} : vector<8x3xbf16>, vector<3x32xbf16>, vector<8x32xf32> -> vector<8x32xf32>
    %5 = vector.extract_strided_slice %4 {offsets = [0, 0], sizes = [8, 16], strides = [1, 1]} : vector<8x32xf32> to vector<8x16xf32>
    %6 = vector.extract_strided_slice %4 {offsets = [0, 16], sizes = [8, 16], strides = [1, 1]} : vector<8x32xf32> to vector<8x16xf32>
    %7 = tpu.iota {dimensions = array<i32: 1>} : vector<8x34xi32>
    %8 = vector.extract_strided_slice %1 {offsets = [0, 0], sizes = [8, 1], strides = [1, 1]} : vector<8x5xi32> to vector<8x1xi32>
    %9 = vector.broadcast %8 : vector<8x1xi32> to vector<8x34xi32>
    %10 = arith.cmpi eq, %7, %9 : vector<8x34xi32>
    %11 = vector.extract_strided_slice %1 {offsets = [0, 1], sizes = [8, 1], strides = [1, 1]} : vector<8x5xi32> to vector<8x1xi32>
    %12 = vector.broadcast %11 : vector<8x1xi32> to vector<8x34xi32>
    %13 = arith.cmpi eq, %7, %12 : vector<8x34xi32>
    %14 = arith.ori %10, %13 : vector<8x34xi1>
    %15 = vector.extract_strided_slice %1 {offsets = [0, 2], sizes = [8, 1], strides = [1, 1]} : vector<8x5xi32> to vector<8x1xi32>
    %16 = vector.broadcast %15 : vector<8x1xi32> to vector<8x34xi32>
    %17 = arith.cmpi eq, %7, %16 : vector<8x34xi32>
    %18 = arith.ori %14, %17 : vector<8x34xi1>
    %19 = vector.extract_strided_slice %1 {offsets = [0, 3], sizes = [8, 1], strides = [1, 1]} : vector<8x5xi32> to vector<8x1xi32>
    %20 = vector.broadcast %19 : vector<8x1xi32> to vector<8x34xi32>
    %21 = arith.cmpi eq, %7, %20 : vector<8x34xi32>
    %22 = arith.ori %18, %21 : vector<8x34xi1>
    %23 = vector.extract_strided_slice %1 {offsets = [0, 4], sizes = [8, 1], strides = [1, 1]} : vector<8x5xi32> to vector<8x1xi32>
    %24 = vector.broadcast %23 : vector<8x1xi32> to vector<8x34xi32>
    %25 = arith.cmpi eq, %7, %24 : vector<8x34xi32>
    %26 = arith.ori %22, %25 : vector<8x34xi1>
    %cst_5 = arith.constant 1.000000e+00 : f32
    %cst_6 = arith.constant 0.000000e+00 : f32
    %27 = vector.broadcast %cst_5 : f32 to vector<8x34xf32>
    %28 = vector.broadcast %cst_6 : f32 to vector<8x34xf32>
    %29 = arith.select %26, %27, %28 : vector<8x34xi1>, vector<8x34xf32>
    %30 = arith.truncf %29 : vector<8x34xf32> to vector<8x34xbf16>
    %c16 = arith.constant 16 : index
    %c0_7 = arith.constant 0 : index
    %31 = vector.load %arg3[%c16, %c0_7] : memref<112x32xbf16, #tpu.memory_space<vmem>>, vector<34x16xbf16>
    %cst_8 = arith.constant dense<0.000000e+00> : vector<8x16xf32>
    %32 = tpu.matmul %30, %31, %cst_8 {dimension_numbers = #tpu.dot_dimension_numbers<[1], [0], [0], [1], [0, 0, 1, 1], [], []>} : vector<8x34xbf16>, vector<34x16xbf16>, vector<8x16xf32> -> vector<8x16xf32>
    %33 = arith.addf %5, %32 : vector<8x16xf32>
    %c0_9 = arith.constant 0 : index
    %c0_10 = arith.constant 0 : index
    %34 = vector.load %arg4[%c0_9, %c0_10] : memref<8x16xf32, #tpu.memory_space<vmem>>, vector<1x16xf32>
    %35 = vector.broadcast %34 : vector<1x16xf32> to vector<8x16xf32>
    %36 = arith.addf %33, %35 : vector<8x16xf32>
    %37 = arith.truncf %36 : vector<8x16xf32> to vector<8x16xbf16>
    %c64 = arith.constant 64 : index
    %c0_11 = arith.constant 0 : index
    %38 = vector.load %arg3[%c64, %c0_11] : memref<112x32xbf16, #tpu.memory_space<vmem>>, vector<16x16xbf16>
    %cst_12 = arith.constant dense<0.000000e+00> : vector<8x16xf32>
    %39 = tpu.matmul %37, %38, %cst_12 {dimension_numbers = #tpu.dot_dimension_numbers<[1], [0], [0], [1], [0, 0, 1, 1], [], []>} : vector<8x16xbf16>, vector<16x16xbf16>, vector<8x16xf32> -> vector<8x16xf32>
    %c1 = arith.constant 1 : index
    %c0_13 = arith.constant 0 : index
    %40 = vector.load %arg4[%c1, %c0_13] : memref<8x16xf32, #tpu.memory_space<vmem>>, vector<1x16xf32>
    %41 = vector.broadcast %40 : vector<1x16xf32> to vector<8x16xf32>
    %42 = arith.addf %39, %41 : vector<8x16xf32>
    %cst_14 = arith.constant 0.000000e+00 : f32
    %43 = vector.broadcast %cst_14 : f32 to vector<8x16xf32>
    %44 = arith.maximumf %42, %43 : vector<8x16xf32>
    %45 = arith.truncf %44 : vector<8x16xf32> to vector<8x16xbf16>
    %c80 = arith.constant 80 : index
    %c0_15 = arith.constant 0 : index
    %46 = vector.load %arg3[%c80, %c0_15] : memref<112x32xbf16, #tpu.memory_space<vmem>>, vector<16x16xbf16>
    %cst_16 = arith.constant dense<0.000000e+00> : vector<8x16xf32>
    %47 = tpu.matmul %45, %46, %cst_16 {dimension_numbers = #tpu.dot_dimension_numbers<[1], [0], [0], [1], [0, 0, 1, 1], [], []>} : vector<8x16xbf16>, vector<16x16xbf16>, vector<8x16xf32> -> vector<8x16xf32>
    %48 = arith.addf %6, %47 : vector<8x16xf32>
    %c2 = arith.constant 2 : index
    %c0_17 = arith.constant 0 : index
    %49 = vector.load %arg4[%c2, %c0_17] : memref<8x16xf32, #tpu.memory_space<vmem>>, vector<1x16xf32>
    %50 = vector.broadcast %49 : vector<1x16xf32> to vector<8x16xf32>
    %51 = arith.addf %48, %50 : vector<8x16xf32>
    %52 = arith.truncf %51 : vector<8x16xf32> to vector<8x16xbf16>
    %c96 = arith.constant 96 : index
    %c0_18 = arith.constant 0 : index
    %53 = vector.load %arg3[%c96, %c0_18] : memref<112x32xbf16, #tpu.memory_space<vmem>>, vector<16x16xbf16>
    %cst_19 = arith.constant dense<0.000000e+00> : vector<8x16xf32>
    %54 = tpu.matmul %52, %53, %cst_19 {dimension_numbers = #tpu.dot_dimension_numbers<[1], [0], [0], [1], [0, 0, 1, 1], [], []>} : vector<8x16xbf16>, vector<16x16xbf16>, vector<8x16xf32> -> vector<8x16xf32>
    %c3 = arith.constant 3 : index
    %c0_20 = arith.constant 0 : index
    %55 = vector.load %arg4[%c3, %c0_20] : memref<8x16xf32, #tpu.memory_space<vmem>>, vector<1x16xf32>
    %56 = vector.broadcast %55 : vector<1x16xf32> to vector<8x16xf32>
    %57 = arith.addf %54, %56 : vector<8x16xf32>
    %cst_21 = arith.constant 0.000000e+00 : f32
    %58 = vector.broadcast %cst_21 : f32 to vector<8x16xf32>
    %59 = arith.maximumf %57, %58 : vector<8x16xf32>
    %c6 = arith.constant 6 : index
    %c0_22 = arith.constant 0 : index
    %60 = vector.load %arg4[%c6, %c0_22] : memref<8x16xf32, #tpu.memory_space<vmem>>, vector<1x1xf32>
    %c4 = arith.constant 4 : index
    %c0_23 = arith.constant 0 : index
    %61 = vector.load %arg4[%c4, %c0_23] : memref<8x16xf32, #tpu.memory_space<vmem>>, vector<1x16xf32>
    %62 = vector.broadcast %61 : vector<1x16xf32> to vector<8x16xf32>
    %63 = arith.mulf %44, %62 : vector<8x16xf32>
    %cst_24 = arith.constant dense<0.000000e+00> : vector<8xf32>
    %64 = vector.multi_reduction <add>, %63, %cst_24 [1] : vector<8x16xf32> to vector<8xf32>
    %65 = vector.shape_cast %64 : vector<8xf32> to vector<8x1xf32>
    %66 = vector.broadcast %60 : vector<1x1xf32> to vector<8x1xf32>
    %67 = arith.addf %66, %65 : vector<8x1xf32>
    %c5 = arith.constant 5 : index
    %c0_25 = arith.constant 0 : index
    %68 = vector.load %arg4[%c5, %c0_25] : memref<8x16xf32, #tpu.memory_space<vmem>>, vector<1x16xf32>
    %69 = vector.broadcast %68 : vector<1x16xf32> to vector<8x16xf32>
    %70 = arith.mulf %59, %69 : vector<8x16xf32>
    %cst_26 = arith.constant dense<0.000000e+00> : vector<8xf32>
    %71 = vector.multi_reduction <add>, %70, %cst_26 [1] : vector<8x16xf32> to vector<8xf32>
    %72 = vector.shape_cast %71 : vector<8xf32> to vector<8x1xf32>
    %73 = arith.addf %67, %72 : vector<8x1xf32>
    %c0_27 = arith.constant 0 : index
    %c0_28 = arith.constant 0 : index
    %74 = vector.load %arg5[%c0_27, %c0_28] : memref<8x1xf32, #tpu.memory_space<vmem>>, vector<8x1xf32>
    tpu.vector_store %arg5[%c0_27, %c0_28], %73 {strides = array<i32>} : memref<8x1xf32, #tpu.memory_space<vmem>>, vector<8x1xf32>,
    return
  }
  func.func @transform_0(%arg0: i32) -> (i32, i32) {
    %c0_i32 = arith.constant 0 : i32
    %c0_i32_0 = arith.constant 0 : i32
    return %arg0, %c0_i32 : i32, i32
  }
  func.func @transform_1(%arg0: i32) -> (i32, i32) {
    %c0_i32 = arith.constant 0 : i32
    %c0_i32_0 = arith.constant 0 : i32
    return %arg0, %c0_i32 : i32, i32
  }
  func.func @transform_2(%arg0: i32) -> (i32, i32) {
    %c0_i32 = arith.constant 0 : i32
    %c0_i32_0 = arith.constant 0 : i32
    %c0_i32_1 = arith.constant 0 : i32
    return %c0_i32, %c0_i32_0 : i32, i32
  }
  func.func @transform_3(%arg0: i32) -> (i32, i32) {
    %c0_i32 = arith.constant 0 : i32
    %c0_i32_0 = arith.constant 0 : i32
    %c0_i32_1 = arith.constant 0 : i32
    return %c0_i32, %c0_i32_0 : i32, i32
  }
  func.func @transform_4(%arg0: i32) -> (i32, i32) {
    %c0_i32 = arith.constant 0 : i32
    %c0_i32_0 = arith.constant 0 : i32
    return %arg0, %c0_i32 : i32, i32
  }
}

</mosaic_0001>

<bundles_post_ra>
// kernel: forward.1
= control target key start
LH: loop header
LB: loop body
LE: loop exit
PB: predicated region body
PF: predicated region fallthrough
CT: control target
= control target key end

     0   :  { %v289_v0 = vmov 0   ;;  %v290_v2 = vmov 2   ;;  %v291_v3 = vmov 4   ;;  %v292_v4 = vmov 1   ;;  %s296_s7 = smov 16   ;;  %s297_s14 = smov 112   ;;  %s379_s1 = inlined_call_operand.vmem [shape: s32[8,5], index: 1, kind: input, shape index: {}]   ;;  %s380_s2 = inlined_call_operand.vmem [shape: bf16[112,32], index: 2, kind: input, shape index: {}]   ;;  %s381_s0 = inlined_call_operand.vmem [shape: f32[8,3], index: 0, kind: input, shape index: {}]   ;;  %s382_s3 = inlined_call_operand.vmem [shape: f32[8,16], index: 3, kind: input, shape index: {}]   ;;  %s383_s4 = inlined_call_operand.vmem [shape: f32[8,1], index: 4, kind: output, shape index: {}]  }
   0x1   :  { %276 = vset.pattern.permute.xlu0 %v289_v0  ;;  %v19_v1 = vld [vmem:[%s379_s1] sm:$0xff]  ;;  %278 = vset.pattern.permute.xlu1 %v290_v2  ;;  %v293_v5 = vmov 3   ;;  %vm26_vm0 = vcmask 1040384   ;;  %vm27_vm1 = vcmask 1041408   ;;  %v294_v7 = vmov 65535   ;;  %v263_v17 = vld [vmem:[%s380_s2 + $0x10] sm:$0xff] }
   0x2   :  { %49 = vperm.xlu0 %276, %v19_v1   ;;  %58 = vperm.xlu1 %278, %v19_v1   ;;  %v20_v6 = vld [vmem:[%s380_s2] sm:$0x3]  ;;  %v28_v8 = vsel %vm26_vm0, 4294967295, %v294_v7  ;;  %v78_v9 = vld [vmem:[%s380_s2 + $0x18] sm:$0x1]  ;;  %vm22_vm2 = vcmask 23552   ;;  %v46_v21 = vlaneseq }
   0x3   :  { %280 = vset.pattern.permute.xlu2 %v291_v3  ;;  %v29_v10 = vsel %vm27_vm1, %v28_v8, 0  ;;  %v88_v11 = vunpack.c.l.b16 %v78_v9  ;;  %v18_v15 = vld [vmem:[%s381_s0] sm:$0xff]  ;;  %v262_v18 = vld [vmem:[%s380_s2 + $0x8] sm:$0xff]  ;;  %v295_v26 = vmov 0.0   ;;  %vm94_vm12 = vcmask 277504   ;;  %v266_v51 = vld [vmem:[%s380_s2 + $0x30] sm:$0xff] }
   0x4   :  { %68 = vperm.xlu2 %280, %v19_v1   ;;  %v31_v12 = vand.u32 %v29_v10, %v20_v6  ;;  %v21_v16 = vpack.c.bf16 %v18_v15, %v18_v15  ;;  %v47_v22 = vand.u32 127, %v46_v21  ;;  %v264_v31 = vld [vmem:[%s380_s2 + $0x20] sm:$0xff]  ;;  %vm129_vm13 = vcmask 130048   ;;  %v265_v38 = vld [vmem:[%s380_s2 + $0x28] sm:$0xff] }
   0x5   :  { %v91_v13 = vpack.c.b16 %v88_v11, %v88_v11  ;;  %140 = vmatpush.bf16.msra.mxu2 %v264_v31  ;;  %v282_v32 = vld [vmem:[%s382_s3] ss:$0 sm:$0xff]  ;;  %166 = vmatpush.bf16.msra.mxu3 %v265_v38  ;;  %v285_v39 = vld [vmem:[%s382_s3 + $0x2] ss:$0 sm:$0xff]  ;;  %v283_v40 = vld [vmem:[%s382_s3 + $0x1] ss:$0 sm:$0xff] }
   0x6   :  { %40 = vmatpush.bf16.msra.mxu0 %v31_v12  ;;  %v284_v43 = vld [vmem:[%s382_s3 + $0x4] ss:$0 sm:$0xff]  ;;  %v287_v58 = vld [vmem:[%s382_s3 + $0x3] ss:$0 sm:$0xff]  ;;  %v288_v61 = vld [vmem:[%s382_s3 + $0x5] ss:$0 sm:$0xff] }
   0x7   :  { %v99_v14 = vsel %vm26_vm0, %v91_v13, 0  ;;  %v286_v2 = vld [vmem:[%s382_s3 + $0x6] ss:$0 sm:$0xff]  ;;  %vm231_vm14 = vcmask 7168  }
   0x8   :  { %106 = vmatpush.bf16.msra.mxu1 %v99_v14 }
   0x9   :  { %237 = vmatmul.msk.bf16.vlgmr.msra.gmra.mxu0 %vm22_vm2, %v21_v16 }
   0xa   :  { %277 = vset.pattern.permute.xlu0 %v292_v4  ;;  %279 = vset.pattern.permute.xlu1 %v293_v5 }
   0xb   :  { %53 = vperm.xlu0 %277, %v19_v1   ;;  %63 = vperm.xlu1 %279, %v19_v1  }
   0xc   :  { %107 = vmatpush.bf16.msra.mxu1 %v263_v17  ;;  %208 = vmatpush.bf16.msrb.mxu0 %v266_v51 }
  0x10   :  { %108 = vmatpush.bf16.msra.mxu1 %v262_v18 }
  0x13   :  { %281 = vset.pattern.permute.xlu0 %v291_v3  ;;  %180 = vrot.lane.b32.xlu1 %v285_v39, %s296_s7 }
  0x5e   :  { %v69_v23 = vpop.permute.xlu2 %68 }
  0x5f   :  { %vm70_vm8 = vcmp.eq.s32.totalorder %v47_v22, %v69_v23 }
  0x74   :  { %v50_v19 = vpop.permute.xlu0 %49  ;;  %v59_v20 = vpop.permute.xlu1 %58 }
  0x75   :  { %vm51_vm3 = vcmp.eq.s32.totalorder %v47_v22, %v50_v19  ;;  %vm60_vm6 = vcmp.eq.s32.totalorder %v47_v22, %v59_v20 }
  0x7d   :  { %v54_v24 = vpop.permute.xlu0 %53  ;;  %v64_v25 = vpop.permute.xlu1 %63 }
  0x7e   :  { %vm55_vm4 = vcmp.eq.s32.totalorder %v47_v22, %v54_v24  ;;  %vm65_vm5 = vcmp.eq.s32.totalorder %v47_v22, %v64_v25 }
  0x7f   :  { %vm56_vm7 = vmor %vm51_vm3, %vm55_vm4 }
  0x80   :  { %vm61_vm9 = vmor %vm56_vm7, %vm60_vm6 }
  0x81   :  { %vm66_vm10 = vmor %vm61_vm9, %vm65_vm5 }
  0x82   :  { %vm71_vm11 = vmor %vm66_vm10, %vm70_vm8 }
  0x83   :  { %v72_v27 = vsel %vm71_vm11, 1.0, %v295_v26 }
  0x84   :  { %v73_v28 = vpack.c.bf16 %v72_v27, %v72_v27 }
  0x85   :  { %v181_v53 = vpop.permute.xlu1 %180 }
  0x86   :  { %246 = vmatmul.msk.bf16.vlgmr.msra.gmra.mxu1 %vm94_vm12, %v73_v28  ;;  %v42_v29 = vpop.f32.mrf.mxu0 }
  0x8e   :  { %v44_v30 = vpop.f32.mrf.mxu0 }
 0x103   :  { %v110_v33 = vpop.f32.mrf.mxu1 }
 0x104   :  { %v114_v34 = vadd.f32 %v110_v33, %v42_v29 }
 0x106   :  { %v117_v35 = vadd.f32 %v282_v32, %v114_v34 }
 0x108   :  { %v118_v36 = vpack.c.bf16 %v117_v35, %v117_v35 }
 0x10a   :  { %251 = vmatmul.msk.bf16.vlgmr.msra.gmra.mxu2 %vm129_vm13, %v118_v36 }
 0x10b   :  { %v112_v37 = vpop.f32.mrf.mxu1 }
 0x18d   :  { %v142_v41 = vpop.f32.mrf.mxu2 }
 0x18e   :  { %v143_v42 = vadd.f32 %v283_v40, %v142_v41 }
 0x190   :  { %v146_v44 = vmax.f32 %v143_v42, 0.0 }
 0x192   :  { %v147_v45 = vpack.c.bf16 %v146_v44, %v146_v44  ;;  %v218_v46 = vmul.f32 %v284_v43, %v146_v44 }
 0x194   :  { %256 = vmatmul.msk.bf16.vlgmr.msra.gmra.mxu3 %vm129_vm13, %v147_v45  ;;  %v219_v47 = vsel %vm129_vm13, %v218_v46, 0.0 }
 0x195   :  { %v144_v48 = vpop.f32.mrf.mxu2  ;;  %220 = vadd.xlane.f32.xlu0 %v219_v47 }
 0x208   :  { %v221_v3 = vpop.xlane.xlu0 %220 }
 0x209   :  { %v223_v4 = vadd.f32 %v286_v2, %v221_v3 }
 0x217   :  { %v168_v49 = vpop.f32.mrf.mxu3 }
 0x218   :  { %173 = vrot.lane.b32.xlu2 %v168_v49, %s296_s7 }
 0x21f   :  { %v170_v50 = vpop.f32.mrf.mxu3 }
 0x272   :  { %v174_v52 = vpop.permute.xlu2 %173 }
 0x273   :  { %v176_v54 = vadd.f32 %v174_v52, %v42_v29 }
 0x275   :  { %v183_v55 = vadd.f32 %v181_v53, %v176_v54 }
 0x277   :  { %v184_v56 = vpack.c.bf16 %v183_v55, %v183_v55 }
 0x279   :  { %190 = vrot.lane.b32.xlu2 %v184_v56, %s297_s14 }
 0x2d3   :  { %v191_v57 = vpop.permute.xlu2 %190 }
 0x2d4   :  { %261 = vmatmul.msk.bf16.vlgmr.msrb.gmra.mxu0 %vm129_vm13, %v191_v57 }
 0x351   :  { %v210_v59 = vpop.f32.mrf.mxu0 }
 0x352   :  { %v211_v60 = vadd.f32 %v287_v58, %v210_v59 }
 0x354   :  { %v214_v62 = vmax.f32 %v211_v60, 0.0 }
 0x356   :  { %v226_v63 = vmul.f32 %v288_v61, %v214_v62 }
 0x358   :  { %v227_v0 = vsel %vm129_vm13, %v226_v63, 0.0 }
 0x359   :  { %v212_v1 = vpop.f32.mrf.mxu0  ;;  %228 = vadd.xlane.f32.xlu1 %v227_v0 }
 0x3cc   :  { %v229_v5 = vpop.xlane.xlu1 %228 }
 0x3cd   :  { %v230_v6 = vadd.f32 %v229_v5, %v223_v4 }
 0x3cf   :  { %232 = vst.msk [vmem:[%s383_s4] sm:$0xff] %vm231_vm14, %v230_v6 }

</bundles_post_ra>
